<compile_context>
chip_gen: v7x
topology: tpu7x:2x2x1
jax: 0.10.0
libtpu: 0.0.40
codegen_flags: <defaults>
</compile_context>

<pallas_src>
import math
from functools import partial
from types import SimpleNamespace

import jax
import jax.numpy as jnp
from jax.experimental import pallas as pl
from jax.experimental.pallas import tpu as pltpu

FP8_E4M3_MAX = 448.0  # max finite value of float8_e4m3fn


def _quantize_kernel(x_ref, q_ref, s_ref, *, group_size):
    """Per-row, per-(1 x group_size) group abs-max quantization.

    x_ref : (tm, H)       input tile (any float dtype; computed in f32)
    q_ref : (tm, H)       quantized values, float8_e4m3fn (cast in-kernel)
    s_ref : (tm, H // G)  per-group scales (float32)
    """
    x = x_ref[...].astype(jnp.float32)            # (tm, H)
    tm, h = x.shape
    n_groups = h // group_size

    g = x.reshape(tm, n_groups, group_size)       # (tm, G_n, G)
    amax = jnp.max(jnp.abs(g), axis=-1)           # (tm, G_n)
    scale = amax / FP8_E4M3_MAX                   # (tm, G_n)

    # Guard all-zero groups so we don't produce NaN; quantized value is 0 anyway.
    safe_scale = jnp.where(scale == 0.0, 1.0, scale)
    # EUP reciprocal on only tm * H/16 elements (nearly free) + one broadcast
    # multiply on the full tile, instead of a full-tile divide.
    inv_scale = pl.reciprocal(safe_scale, approx=True)       # (tm, G_n)
    q = g * inv_scale[:, :, None]                            # (tm, G_n, G)

    q_ref[...] = q.reshape(tm, h).astype(q_ref.dtype)        # f32 -> fp8 in-kernel
    s_ref[...] = scale.astype(s_ref.dtype)


def _pick_tile_m(m, h, group_size, in_dtype):
    """Largest row tile whose double-buffered working set fits a conservative
    VMEM budget (safe on v5e 16 MiB default scoped, v6e 32 MiB, v7x 64 MiB phys)."""
    in_bytes = jnp.dtype(in_dtype).itemsize
    # input tile + fp8 output tile + f32 scale tile, per row
    bytes_per_row = h * in_bytes + h * 1 + (h // group_size) * 4
    budget = 12 * 1024 * 1024                    # double-buffered target
    t = int(budget // (2 * bytes_per_row))
    t = max(8, min(1024, t))
    if t >= 32:
        t = (t // 32) * 32                       # fp8 sublane packing friendly
    else:
        t = (t // 8) * 8
    t = max(t, 8)
    if m <= t:
        return m                                 # single full block
    return t                                     # cdiv(m, t) >= 2 -> both v7x cores busy


def coat_quantize_bgn_forward(x, group_size=16, training=True, *, tile_m=None):
    """JAX/Pallas equivalent of Coat_quantize_bgn.forward.

    Returns (input, Qoutput(float8_e4m3fn), Oscale(float32)) in training mode,
    (input, None, None) otherwise.
    """
    if not training:
        return x, None, None

    orig_shape = x.shape
    h = orig_shape[-1]
    assert h % group_size == 0, "hidden dim must be divisible by group_size"
    m = math.prod(orig_shape[:-1])
    n_groups = h // group_size

    x2 = x.reshape(m, h)

    if tile_m is None:
        tile_m = _pick_tile_m(m, h, group_size, x.dtype)
    grid = (pl.cdiv(m, tile_m),)                  # ragged last block handled by Pallas

    q2, s2 = pl.pallas_call(
        partial(_quantize_kernel, group_size=group_size),
        out_shape=(
            jax.ShapeDtypeStruct((m, h), jnp.float8_e4m3fn),
            jax.ShapeDtypeStruct((m, n_groups), jnp.float32),
        ),
        grid_spec=pltpu.PrefetchScalarGridSpec(
            num_scalar_prefetch=0,
            grid=grid,
            in_specs=[pl.BlockSpec((tile_m, h), lambda i: (i, 0))],
            out_specs=[
                pl.BlockSpec((tile_m, h), lambda i: (i, 0)),
                pl.BlockSpec((tile_m, n_groups), lambda i: (i, 0)),
            ],
        ),
        compiler_params=pltpu.CompilerParams(
            dimension_semantics=("parallel",),
            vmem_limit_bytes=32 * 1024 * 1024,    # safe on all gens (v7x phys = 64 MiB)
        ),
    )(x2)

    q_fp8 = q2.reshape(orig_shape)
    oscale = s2.reshape(orig_shape[:-1] + (n_groups,))
    return x, q_fp8, oscale


class CoatQuantizeBgn:
    """Thin stateless wrapper mirroring the nn.Module interface."""

    def __init__(self, args=None, layer_type=""):
        self.args = args
        self.fp8type = args.fabit
        self.layer_type = layer_type
        self.training = True

    def __call__(self, x):
        return coat_quantize_bgn_forward(
            x, group_size=self.args.group_size, training=self.training
        )


# TODO(synk): backward of Coat_quantize_bgn_func is a straight pass-through of
# grad_output (no kernel needed); only the forward is implemented here.


if __name__ == "__main__":
    # deterministic synthetic config + input (batch=2, seq=16, hidden=128, group_size=16)
    args = SimpleNamespace(fabit="E4M3", group_size=16)
    module = CoatQuantizeBgn(args, layer_type="bgn")

    key = jax.random.PRNGKey(0)
    batch, seq, hidden = 2, 16, 128
    x = jax.random.normal(key, (batch, seq, hidden), dtype=jnp.float32)

    out_input, q_out, o_scale = module(x)
    jax.block_until_ready((out_input, q_out, o_scale))

    # light sanity checks against a pure-JAX reference
    gs = args.group_size
    n_groups = hidden // gs
    xr = x.reshape(batch, seq, n_groups, gs)
    amax_ref = jnp.max(jnp.abs(xr), axis=-1)
    scale_ref = amax_ref / FP8_E4M3_MAX

    assert out_input.shape == x.shape and bool(jnp.all(out_input == x))
    assert q_out.dtype == jnp.float8_e4m3fn and q_out.shape == x.shape
    assert o_scale.shape == (batch, seq, n_groups)
    assert bool(jnp.allclose(o_scale, scale_ref, rtol=1e-6, atol=1e-6))

    # fp8 e4m3 round-trip: |error| <= half-ulp at top binade (amax/28) + recip slack
    deq = q_out.astype(jnp.float32).reshape(batch, seq, n_groups, gs) * scale_ref[..., None]
    err = jnp.abs(deq - xr)
    tol = amax_ref[..., None] * 0.05 + 1e-6
    assert bool(jnp.all(err <= tol))

    print("KERNEL_OK")
</pallas_src>

<mosaic_0001>
module attributes {stable_mosaic.version = 11 : i64} {
  func.func @_quantize_kernel(%arg0: i32, %arg1: memref<32x128xf32, #tpu.memory_space<vmem>>, %arg2: memref<32x128xf8E4M3FN, #tpu.memory_space<vmem>>, %arg3: memref<32x8xf32, #tpu.memory_space<vmem>>) attributes {dimension_semantics = [#tpu.dimension_semantics<parallel>], iteration_bounds = array<i64: 1>, scalar_prefetch = 0 : i64, scratch_operands = 0 : i64, tpu.core_type = #tpu.core_type<tc>, window_params = [{transform_indices = @transform_0, window_bounds = array<i64: 32, 128>}, {transform_indices = @transform_1, window_bounds = array<i64: 32, 128>}, {transform_indices = @transform_2, window_bounds = array<i64: 32, 8>}]} {
    %c0 = arith.constant 0 : index
    %c0_0 = arith.constant 0 : index
    %0 = vector.load %arg1[%c0, %c0_0] : memref<32x128xf32, #tpu.memory_space<vmem>>, vector<32x128xf32>
    %1 = vector.shape_cast %0 : vector<32x128xf32> to vector<32x8x16xf32>
    %2 = math.absf %1 : vector<32x8x16xf32>
    %cst = arith.constant dense<0xFF800000> : vector<32x8xf32>
    %3 = vector.multi_reduction <maximumf>, %2, %cst [2] : vector<32x8x16xf32> to vector<32x8xf32>
    %cst_1 = arith.constant 4.480000e+02 : f32
    %4 = vector.broadcast %cst_1 : f32 to vector<32x8xf32>
    %5 = arith.divf %3, %4 : vector<32x8xf32>
    %cst_2 = arith.constant 0.000000e+00 : f32
    %6 = vector.broadcast %cst_2 : f32 to vector<32x8xf32>
    %7 = arith.cmpf oeq, %5, %6 : vector<32x8xf32>
    %cst_3 = arith.constant 1.000000e+00 : f32
    %8 = vector.broadcast %cst_3 : f32 to vector<32x8xf32>
    %9 = arith.select %7, %8, %5 : vector<32x8xi1>, vector<32x8xf32>
    %10 = tpu.reciprocal %9 {approx = true} : vector<32x8xf32> -> vector<32x8xf32>
    %11 = vector.shape_cast %10 : vector<32x8xf32> to vector<32x8x1xf32>
    %12 = vector.broadcast %11 : vector<32x8x1xf32> to vector<32x8x16xf32>
    %13 = arith.mulf %1, %12 : vector<32x8x16xf32>
    %14 = vector.shape_cast %13 : vector<32x8x16xf32> to vector<32x128xf32>
    %15 = arith.truncf %14 : vector<32x128xf32> to vector<32x128xf8E4M3FN>
    %c0_4 = arith.constant 0 : index
    %c0_5 = arith.constant 0 : index
    %16 = vector.load %arg2[%c0_4, %c0_5] : memref<32x128xf8E4M3FN, #tpu.memory_space<vmem>>, vector<32x128xf8E4M3FN>
    tpu.vector_store %arg2[%c0_4, %c0_5], %15 {strides = array<i32>} : memref<32x128xf8E4M3FN, #tpu.memory_space<vmem>>, vector<32x128xf8E4M3FN>,
    %c0_6 = arith.constant 0 : index
    %c0_7 = arith.constant 0 : index
    %17 = vector.load %arg3[%c0_6, %c0_7] : memref<32x8xf32, #tpu.memory_space<vmem>>, vector<32x8xf32>
    tpu.vector_store %arg3[%c0_6, %c0_7], %5 {strides = array<i32>} : memref<32x8xf32, #tpu.memory_space<vmem>>, vector<32x8xf32>,
    return
  }
  func.func @transform_0(%arg0: i32) -> (i32, i32) {
    %c0_i32 = arith.constant 0 : i32
    %c0_i32_0 = arith.constant 0 : i32
    return %arg0, %c0_i32 : i32, i32
  }
  func.func @transform_1(%arg0: i32) -> (i32, i32) {
    %c0_i32 = arith.constant 0 : i32
    %c0_i32_0 = arith.constant 0 : i32
    return %arg0, %c0_i32 : i32, i32
  }
  func.func @transform_2(%arg0: i32) -> (i32, i32) {
    %c0_i32 = arith.constant 0 : i32
    %c0_i32_0 = arith.constant 0 : i32
    return %arg0, %c0_i32 : i32, i32
  }
}

</mosaic_0001>

<bundles_post_ra>
// kernel: tpu_custom_call.1
= control target key start
LH: loop header
LB: loop body
LE: loop exit
PB: predicated region body
PF: predicated region fallthrough
CT: control target
= control target key end

     0   :  { %8 = vsyncpa [#allocation3], 0  ;;  %s2917_s0 = inlined_call_operand.hbm [shape: f32[32,128], index: 0, kind: input, shape index: {}]   ;;  %s2918_s1 = inlined_call_operand.hbm [shape: f8e4m3fn[32,128], index: 1, kind: output, shape index: {0}]   ;;  %s2919_s2 = inlined_call_operand.vmem [shape: f32[32,8], index: 2, kind: output, shape index: {1}]  }
   0x1   :  { %9 = vsyncpa [#allocation4], 0  ;;  %s2002_s9 = smov [#allocation2]   ;;  %s1954_s13 = scalar_lea.hbm %s2917_s0, 512 }
   0x2   :  { %s15_s10 = sshll.u32 %s2002_s9, 4  ;;  %p1955_p0 = scmp.ne.s32.totalorder %s2917_s0, %s1954_s13  ;;  %s16_s10 = int_to_ptr.vmem [resolvable:$true] %s15_s10 }
   0x3   :  { %p1958_p1 = scmp.lt.u32.totalorder %s1954_s13, %s2917_s0 }
   0x5   :  { %p1960_p2 = pnand %p1958_p1, %p1955_p0 }
   0x7   :  { %1963 = shalt.err (!%p1960_p2)
}
   0x8   :  { %s1964_s18 = scalar_lea.vmem %s16_s10, 512  ;;  %p1969_p4 = scmp.lt.s32.totalorder %s16_s10, %s16_s10 }
   0x9   :  { %p1965_p3 = scmp.ne.s32.totalorder %s16_s10, %s1964_s18  ;;  %p1970_p5 = scmp.lt.s32.totalorder %s1964_s18, %s1964_s18 }
   0xb   :  { %p1971_p6 = por %p1970_p5, %p1969_p4 }
   0xd   :  { %p1972_p7 = pnand %p1971_p6, %p1965_p3 }
   0xf   :  { %1975 = shalt.err (!%p1972_p7)
}
  0x10   :  { %s2003_s19 = smov 128   ;;  %s2004_s20 = smov 8  }
  0x11   :  { %21 = dma.hbm_to_vmem [thread:$0]  %s2917_s0, 512, %s16_s10, [#allocation3], %s2003_s19, %s2003_s19, %s2004_s20  }
  0x12   :  { %1998 = dma.done.wait [#allocation3], 512  }
  0x13   :  { %1999 = vsyncadd [#allocation3], 4294966784  ;;  %v2042_v0 = vld [vmem:[#allocation2 + $0x10] sm:$0xff]  ;;  %v2044_v1 = vld [vmem:[#allocation2] sm:$0xff]  ;;  %s2005_s23 = smov 112   ;;  %s2006_s0 = smov 96   ;;  %v122_v12 = vlaneseq }
  0x14   :  { %37 = vrot.lane.b32.xlu1 %v2042_v0, %s2005_s23  ;;  %33 = vrot.lane.b32.xlu0 %v2044_v1, %s2005_s23  ;;  %v28_v2 = vld [vmem:[#allocation2 + $0x18] sm:$0xff]  ;;  %v2050_v3 = vld [vmem:[#allocation2 + $0x8] sm:$0xff]  ;;  %s2007_s24 = smov 80   ;;  %s2008_s25 = smov 64   ;;  %v2012_v10 = vmov 1983009808  }
  0x15   :  { %s2009_s26 = smov 48   ;;  %s2010_s27 = smov 32   ;;  %v120_v11 = vunpack.c.l.s4 %v2012_v10  ;;  %v2104_v16 = vshrl.u32 %v122_v12, 7  ;;  %v2013_v57 = vmov 1934713408   ;;  %vm693_vm0 = vcmask 130048  }
  0x16   :  { %s2011_s28 = smov 16   ;;  %v184_v58 = vunpack.c.l.s4 %v2013_v57  ;;  %vm1814_vm3 = vcmask 1041409   ;;  %vm1816_vm6 = vcmask 1042434   ;;  %vm1818_vm7 = vcmask 1043459  }
  0x17   :  { %v121_v15 = vunpack.c.0.s8 %v120_v11  ;;  %vm1820_vm10 = vcmask 1044484   ;;  %vm1822_vm11 = vcmask 1045509   ;;  %vm1824_vm14 = vcmask 1046534  }
  0x18   :  { %39 = vrot.lane.b32.xlu1 %v28_v2, %s2005_s23  ;;  %35 = vrot.lane.b32.xlu0 %v2050_v3, %s2005_s23  ;;  %vm1826_vm15 = vcmask 1047559  }
  0x19   :  { %v2109_v21 = vsub.s32 %v121_v15, %v2104_v16 }
  0x1c   :  { %47 = vrot.lane.b32.xlu1 %v2050_v3, %s2006_s0  ;;  %45 = vrot.lane.b32.xlu0 %v2044_v1, %s2006_s0 }
  0x20   :  { %51 = vrot.lane.b32.xlu1 %v28_v2, %s2006_s0  ;;  %49 = vrot.lane.b32.xlu0 %v2042_v0, %s2006_s0 }
  0x24   :  { %59 = vrot.lane.b32.xlu1 %v2050_v3, %s2007_s24  ;;  %57 = vrot.lane.b32.xlu0 %v2044_v1, %s2007_s24 }
  0x28   :  { %63 = vrot.lane.b32.xlu1 %v28_v2, %s2007_s24  ;;  %61 = vrot.lane.b32.xlu0 %v2042_v0, %s2007_s24 }
  0x2c   :  { %71 = vrot.lane.b32.xlu1 %v2050_v3, %s2008_s25  ;;  %69 = vrot.lane.b32.xlu0 %v2044_v1, %s2008_s25 }
  0x30   :  { %75 = vrot.lane.b32.xlu1 %v28_v2, %s2008_s25  ;;  %73 = vrot.lane.b32.xlu0 %v2042_v0, %s2008_s25 }
  0x34   :  { %83 = vrot.lane.b32.xlu1 %v2050_v3, %s2009_s26  ;;  %81 = vrot.lane.b32.xlu0 %v2044_v1, %s2009_s26 }
  0x38   :  { %87 = vrot.lane.b32.xlu1 %v28_v2, %s2009_s26  ;;  %85 = vrot.lane.b32.xlu0 %v2042_v0, %s2009_s26 }
  0x3c   :  { %95 = vrot.lane.b32.xlu1 %v2050_v3, %s2010_s27  ;;  %93 = vrot.lane.b32.xlu0 %v2044_v1, %s2010_s27 }
  0x40   :  { %99 = vrot.lane.b32.xlu1 %v28_v2, %s2010_s27  ;;  %97 = vrot.lane.b32.xlu0 %v2042_v0, %s2010_s27 }
  0x44   :  { %107 = vrot.lane.b32.xlu1 %v2050_v3, %s2011_s28  ;;  %105 = vrot.lane.b32.xlu0 %v2044_v1, %s2011_s28 }
  0x48   :  { %111 = vrot.lane.b32.xlu1 %v28_v2, %s2011_s28  ;;  %109 = vrot.lane.b32.xlu0 %v2042_v0, %s2011_s28 }
  0x86   :  { %v38_v4 = vpop.permute.xlu1 %37  ;;  %v34_v5 = vpop.permute.xlu0 %33 }
  0x8a   :  { %v40_v6 = vpop.permute.xlu1 %39  ;;  %v2097_v7 = vpop.permute.xlu0 %35 }
  0x8e   :  { %v2099_v8 = vpop.permute.xlu1 %47  ;;  %v2101_v9 = vpop.permute.xlu0 %45 }
  0x8f   :  { %v117_v60 = vcombine.low %v2044_v1, %v2101_v9  ;;  %v118_v63 = vcombine.high %v2044_v1, %v2101_v9 }
  0x91   :  { %v132_v15 = vrot.slane %v118_v63, %v2109_v21 }
  0x92   :  { %v52_v13 = vpop.permute.xlu1 %51  ;;  %v50_v14 = vpop.permute.xlu0 %49 }
  0x93   :  { %v525_v19 = vcombine.low %v28_v2, %v52_v13  ;;  %v526_v20 = vcombine.high %v28_v2, %v52_v13  ;;  %v389_v26 = vcombine.low %v2042_v0, %v50_v14  ;;  %v390_v27 = vcombine.high %v2042_v0, %v50_v14 }
  0x94   :  { %v185_v2 = vunpack.c.0.s8 %v184_v58 }
  0x95   :  { %v2112_v24 = vrot.slane %v525_v19, %v2109_v21  ;;  %v2115_v25 = vrot.slane %v526_v20, %v2109_v21  ;;  %v2134_v38 = vrot.slane %v389_v26, %v2109_v21  ;;  %v2137_v39 = vrot.slane %v390_v27, %v2109_v21 }
  0x96   :  { %v2106_v17 = vpop.permute.xlu1 %59  ;;  %v58_v18 = vpop.permute.xlu0 %57  ;;  %v2182_v20 = vsub.s32 %v185_v2, %v2104_v16 }
  0x97   :  { %v133_v56 = vcombine.low %v34_v5, %v58_v18  ;;  %v134_v59 = vcombine.high %v34_v5, %v58_v18  ;;  %v125_v5 = vrot.slane %v117_v60, %v2109_v21  ;;  %v269_v18 = vcombine.low %v2097_v7, %v2106_v17 }
  0x99   :  { %v141_v0 = vrot.slane %v133_v56, %v2109_v21 }
  0x9a   :  { %v64_v22 = vpop.permute.xlu1 %63  ;;  %v62_v23 = vpop.permute.xlu0 %61 }
  0x9b   :  { %v541_v28 = vcombine.low %v40_v6, %v64_v22  ;;  %v542_v29 = vcombine.high %v40_v6, %v64_v22  ;;  %v405_v30 = vcombine.low %v38_v4, %v62_v23  ;;  %v406_v31 = vcombine.high %v38_v4, %v62_v23 }
  0x9c   :  { %v148_v4 = vrot.slane %v134_v59, %v2109_v21  ;;  %v253_v6 = vcombine.low %v2050_v3, %v2099_v8  ;;  %v181_v19 = vcombine.low %v125_v5, %v141_v0 }
  0x9d   :  { %v2122_v34 = vrot.slane %v541_v28, %v2109_v21  ;;  %v2125_v35 = vrot.slane %v542_v29, %v2109_v21  ;;  %v2128_v36 = vrot.slane %v405_v30, %v2109_v21  ;;  %v2131_v37 = vrot.slane %v406_v31, %v2109_v21 }
  0x9e   :  { %v2119_v32 = vpop.permute.xlu1 %71  ;;  %v70_v33 = vpop.permute.xlu0 %69  ;;  %v197_v22 = vcombine.low %v132_v15, %v148_v4  ;;  %v182_v28 = vcombine.high %v125_v5, %v141_v0  ;;  %v2190_v31 = vrot.slane %v253_v6, %v2109_v21  ;;  %v198_v59 = vcombine.high %v132_v15, %v148_v4 }
  0x9f   :  { %v589_v40 = vcombine.low %v2112_v24, %v2122_v34  ;;  %v590_v41 = vcombine.high %v2112_v24, %v2122_v34  ;;  %v605_v42 = vcombine.low %v2115_v25, %v2125_v35  ;;  %v606_v43 = vcombine.high %v2115_v25, %v2125_v35 }
  0xa0   :  { %v453_v44 = vcombine.low %v2134_v38, %v2128_v36  ;;  %v454_v45 = vcombine.high %v2134_v38, %v2128_v36  ;;  %v469_v46 = vcombine.low %v2137_v39, %v2131_v37  ;;  %v470_v47 = vcombine.high %v2137_v39, %v2131_v37 }
  0xa1   :  { %v189_v63 = vrot.slane %v181_v19, %v2182_v20  ;;  %v205_v0 = vrot.slane %v197_v22, %v2182_v20  ;;  %v196_v5 = vrot.slane %v182_v28, %v2182_v20  ;;  %v597_v37 = vrot.slane %v589_v40, %v2182_v20 }
  0xa2   :  { %v2155_v48 = vpop.permute.xlu1 %75  ;;  %v2157_v49 = vpop.permute.xlu0 %73  ;;  %v477_v38 = vrot.slane %v469_v46, %v2182_v20  ;;  %v604_v40 = vrot.slane %v590_v41, %v2182_v20  ;;  %v613_v24 = vrot.slane %v605_v42, %v2182_v20  ;;  %v620_v42 = vrot.slane %v606_v43, %v2182_v20 }
  0xa6   :  { %v2159_v50 = vpop.permute.xlu1 %83  ;;  %v82_v51 = vpop.permute.xlu0 %81 }
  0xaa   :  { %v2161_v52 = vpop.permute.xlu1 %87  ;;  %v2163_v53 = vpop.permute.xlu0 %85 }
  0xae   :  { %v96_v54 = vpop.permute.xlu1 %95  ;;  %v94_v55 = vpop.permute.xlu0 %93 }
  0xaf   :  { %v149_v10 = vcombine.low %v70_v33, %v94_v55  ;;  %v150_v11 = vcombine.high %v70_v33, %v94_v55  ;;  %v277_v33 = vrot.slane %v269_v18, %v2109_v21 }
  0xb1   :  { %v157_v29 = vrot.slane %v149_v10, %v2109_v21  ;;  %v164_v30 = vrot.slane %v150_v11, %v2109_v21  ;;  %v286_v11 = vcombine.high %v2119_v32, %v96_v54 }
  0xb2   :  { %v2167_v61 = vpop.permute.xlu1 %99  ;;  %v2169_v62 = vpop.permute.xlu0 %97 }
  0xb6   :  { %v108_v13 = vpop.permute.xlu1 %107  ;;  %v106_v14 = vpop.permute.xlu0 %105 }
  0xb7   :  { %v165_v1 = vcombine.low %v82_v51, %v106_v14  ;;  %v166_v9 = vcombine.high %v82_v51, %v106_v14  ;;  %v301_v23 = vcombine.low %v2159_v50, %v108_v13  ;;  %v285_v51 = vcombine.low %v2119_v32, %v96_v54 }
  0xb8   :  { %v302_v4 = vcombine.high %v2159_v50, %v108_v13  ;;  %v270_v32 = vcombine.high %v2097_v7, %v2106_v17  ;;  %v317_v50 = vcombine.low %v2190_v31, %v277_v33  ;;  %v212_v54 = vrot.slane %v198_v59, %v2182_v20 }
  0xb9   :  { %v173_v26 = vrot.slane %v165_v1, %v2109_v21  ;;  %v180_v27 = vrot.slane %v166_v9, %v2109_v21  ;;  %v309_v60 = vrot.slane %v301_v23, %v2109_v21  ;;  %v293_v14 = vrot.slane %v285_v51, %v2109_v21 }
  0xba   :  { %v254_v23 = vcombine.high %v2050_v3, %v2099_v8  ;;  %v300_v13 = vrot.slane %v286_v11, %v2109_v21  ;;  %v110_v7 = vpop.permute.xlu0 %109  ;;  %v318_v59 = vcombine.high %v2190_v31, %v277_v33  ;;  %v421_v31 = vcombine.low %v2157_v49, %v2169_v62 }
  0xbb   :  { %v213_v55 = vcombine.low %v157_v29, %v173_v26  ;;  %v214_v56 = vcombine.high %v157_v29, %v173_v26  ;;  %v229_v57 = vcombine.low %v164_v30, %v180_v27  ;;  %v230_v58 = vcombine.high %v164_v30, %v180_v27 }
  0xbc   :  { %v349_v22 = vcombine.low %v293_v14, %v309_v60  ;;  %v316_v26 = vrot.slane %v302_v4, %v2109_v21  ;;  %v350_v29 = vcombine.high %v293_v14, %v309_v60 }
  0xbd   :  { %v221_v2 = vrot.slane %v213_v55, %v2182_v20  ;;  %v237_v6 = vrot.slane %v229_v57, %v2182_v20  ;;  %v228_v10 = vrot.slane %v214_v56, %v2182_v20  ;;  %v244_v15 = vrot.slane %v230_v58, %v2182_v20 }
  0xbe   :  { %v357_v56 = vrot.slane %v349_v22, %v2182_v20  ;;  %v268_v57 = vrot.slane %v254_v23, %v2109_v21  ;;  %v284_v58 = vrot.slane %v270_v32, %v2109_v21  ;;  %v365_v60 = vcombine.low %v300_v13, %v316_v26 }
  0xbf   :  { %v2205_v18 = vcombine.high %v189_v63, %v221_v2  ;;  %v2207_v1 = vcombine.low %v189_v63, %v221_v2  ;;  %v2209_v9 = vcombine.low %v205_v0, %v237_v6  ;;  %v2211_v19 = vcombine.low %v196_v5, %v228_v10 }
  0xc0   :  { %v2225_v8 = vcombine.low %v212_v54, %v244_v15  ;;  %v2229_v55 = vcombine.high %v196_v5, %v228_v10  ;;  %v325_v63 = vrot.slane %v317_v50, %v2182_v20  ;;  %v437_v2 = vcombine.low %v2163_v53, %v110_v7 }
  0xc1   :  { %v662_v27 = vand.u32 2147483647, %v2205_v18  ;;  %v661_v28 = vand.u32 2147483647, %v2207_v1  ;;  %v665_v30 = vand.u32 2147483647, %v2209_v9  ;;  %v2239_v10 = vcombine.high %v205_v0, %v237_v6 }
  0xc2   :  { %v663_v3 = vand.u32 2147483647, %v2211_v19  ;;  %v667_v5 = vand.u32 2147483647, %v2225_v8  ;;  %v664_v4 = vand.u32 2147483647, %v2229_v55  ;;  %v2243_v22 = vcombine.low %v325_v63, %v357_v56 }
  0xc3   :  { %v697_v17 = vsel %vm693_vm0, %v662_v27, -inf  ;;  %v694_v51 = vsel %vm693_vm0, %v661_v28, -inf  ;;  %v706_v11 = vsel %vm693_vm0, %v665_v30, -inf  ;;  %v364_v23 = vrot.slane %v350_v29, %v2182_v20 }
  0xc4   :  { %698 = vmax.xlane.f32.xlu1 %v697_v17  ;;  %695 = vmax.xlane.f32.xlu0 %v694_v51  ;;  %v700_v14 = vsel %vm693_vm0, %v663_v3, -inf  ;;  %v333_v33 = vcombine.low %v268_v57, %v284_v58  ;;  %v366_v32 = vcombine.high %v300_v13, %v316_v26  ;;  %v332_v50 = vrot.slane %v318_v59, %v2182_v20 }
  0xc5   :  { %v445_v0 = vrot.slane %v437_v2, %v2109_v21  ;;  %v712_v6 = vsel %vm693_vm0, %v667_v5, -inf  ;;  %v666_v27 = vand.u32 2147483647, %v2239_v10  ;;  %v2252_v28 = vcombine.high %v212_v54, %v244_v15 }
  0xc6   :  { %v703_v30 = vsel %vm693_vm0, %v664_v4, -inf  ;;  %v669_v29 = vand.u32 2147483647, %v2243_v22  ;;  %v2256_v3 = vcombine.low %v332_v50, %v364_v23  ;;  %v373_v17 = vrot.slane %v365_v60, %v2182_v20 }
  0xc7   :  { %v429_v13 = vrot.slane %v421_v31, %v2109_v21  ;;  %v334_v26 = vcombine.high %v268_v57, %v284_v58  ;;  %v438_v51 = vcombine.high %v2163_v53, %v110_v7  ;;  %v341_v59 = vrot.slane %v333_v33, %v2182_v20  ;;  %v112_v58 = vpop.permute.xlu1 %111 }
  0xc8   :  { %707 = vmax.xlane.f32.xlu1 %v706_v11  ;;  %701 = vmax.xlane.f32.xlu0 %v700_v14  ;;  %v709_v15 = vsel %vm693_vm0, %v666_v27, -inf  ;;  %v668_v54 = vand.u32 2147483647, %v2252_v28  ;;  %v2264_v11 = vcombine.high %v325_v63, %v357_v56  ;;  %v718_v5 = vsel %vm693_vm0, %v669_v29, -inf }
  0xc9   :  { %v485_v2 = vcombine.low %v429_v13, %v445_v0  ;;  %v671_v60 = vand.u32 2147483647, %v2256_v3  ;;  %v2268_v14 = vcombine.low %v341_v59, %v373_v17  ;;  %v380_v4 = vrot.slane %v366_v32, %v2182_v20 }
  0xca   :  { %v422_v53 = vcombine.high %v2157_v49, %v2169_v62  ;;  %v452_v7 = vrot.slane %v438_v51, %v2109_v21  ;;  %v348_v57 = vrot.slane %v334_v26, %v2182_v20  ;;  %v486_v56 = vcombine.high %v429_v13, %v445_v0 }
  0xcb   :  { %v715_v63 = vsel %vm693_vm0, %v668_v54, -inf  ;;  %v670_v31 = vand.u32 2147483647, %v2264_v11  ;;  %v2277_v33 = vcombine.high %v332_v50, %v364_v23  ;;  %v673_v32 = vand.u32 2147483647, %v2268_v14 }
  0xcc   :  { %713 = vmax.xlane.f32.xlu1 %v712_v6  ;;  %704 = vmax.xlane.f32.xlu0 %v703_v30  ;;  %v724_v6 = vsel %vm693_vm0, %v671_v60, -inf  ;;  %v2281_v27 = vcombine.low %v348_v57, %v380_v4  ;;  %v493_v49 = vrot.slane %v485_v2, %v2182_v20  ;;  %v436_v62 = vrot.slane %v422_v53, %v2109_v21 }
  0xcd   :  { %v573_v0 = vcombine.low %v2161_v52, %v112_v58  ;;  %v461_v23 = vrot.slane %v453_v44, %v2182_v20  ;;  %v721_v30 = vsel %vm693_vm0, %v670_v31, -inf  ;;  %v672_v29 = vand.u32 2147483647, %v2277_v33 }
  0xce   :  { %v501_v50 = vcombine.low %v436_v62, %v452_v7  ;;  %v2292_v13 = vcombine.high %v341_v59, %v373_v17  ;;  %v730_v26 = vsel %vm693_vm0, %v673_v32, -inf  ;;  %v675_v51 = vand.u32 2147483647, %v2281_v27 }
  0xcf   :  { %v2296_v2 = vcombine.low %v461_v23, %v493_v49  ;;  %v557_v54 = vcombine.low %v2155_v48, %v2167_v61  ;;  %v581_v44 = vrot.slane %v573_v0, %v2109_v21  ;;  %v468_v17 = vrot.slane %v454_v45, %v2182_v20 }
  0xd0   :  { %719 = vmax.xlane.f32.xlu1 %v718_v5  ;;  %710 = vmax.xlane.f32.xlu0 %v709_v15  ;;  %v500_v15 = vrot.slane %v486_v56, %v2182_v20  ;;  %v502_v59 = vcombine.high %v436_v62, %v452_v7  ;;  %v727_v5 = vsel %vm693_vm0, %v672_v29, -inf  ;;  %v674_v60 = vand.u32 2147483647, %v2292_v13 }
  0xd1   :  { %v2308_v53 = vcombine.high %v348_v57, %v380_v4  ;;  %v736_v56 = vsel %vm693_vm0, %v675_v51, -inf  ;;  %v565_v32 = vrot.slane %v557_v54, %v2109_v21  ;;  %v574_v36 = vcombine.high %v2161_v52, %v112_v58 }
  0xd2   :  { %v2312_v31 = vcombine.low %v468_v17, %v500_v15  ;;  %v733_v4 = vsel %vm693_vm0, %v674_v60, -inf  ;;  %v2323_v57 = vcombine.high %v461_v23, %v493_v49  ;;  %v516_v52 = vrot.slane %v502_v59, %v2182_v20 }
  0xd3   :  { %v621_v45 = vcombine.low %v565_v32, %v581_v44  ;;  %v676_v7 = vand.u32 2147483647, %v2308_v53  ;;  %v558_v58 = vcombine.high %v2155_v48, %v2167_v61  ;;  %v588_v46 = vrot.slane %v574_v36, %v2109_v21 }
  0xd4   :  { %725 = vmax.xlane.f32.xlu1 %v724_v6  ;;  %716 = vmax.xlane.f32.xlu0 %v715_v63  ;;  %v677_v63 = vand.u32 2147483647, %v2296_v2  ;;  %v509_v6 = vrot.slane %v501_v50, %v2182_v20  ;;  %v679_v0 = vand.u32 2147483647, %v2312_v31  ;;  %v484_v49 = vrot.slane %v470_v47, %v2182_v20 }
  0xd5   :  { %v622_v23 = vcombine.high %v565_v32, %v581_v44  ;;  %v678_v29 = vand.u32 2147483647, %v2323_v57  ;;  %v629_v54 = vrot.slane %v621_v45, %v2182_v20  ;;  %v572_v59 = vrot.slane %v558_v58, %v2109_v21 }
  0xd6   :  { %v742_v62 = vsel %vm693_vm0, %v677_v63, -inf  ;;  %v2327_v50 = vcombine.low %v477_v38, %v509_v6  ;;  %v748_v51 = vsel %vm693_vm0, %v679_v0, -inf  ;;  %v2343_v61 = vcombine.low %v484_v49, %v516_v52 }
  0xd7   :  { %v637_v39 = vcombine.low %v572_v59, %v588_v46  ;;  %v745_v47 = vsel %vm693_vm0, %v678_v29, -inf  ;;  %v2353_v44 = vcombine.high %v477_v38, %v509_v6  ;;  %v2357_v60 = vcombine.low %v597_v37, %v629_v54 }
  0xd8   :  { %731 = vmax.xlane.f32.xlu1 %v730_v26  ;;  %722 = vmax.xlane.f32.xlu0 %v721_v30  ;;  %v739_v30 = vsel %vm693_vm0, %v676_v7, -inf  ;;  %v2339_v26 = vcombine.high %v468_v17, %v500_v15  ;;  %v681_v48 = vand.u32 2147483647, %v2327_v50  ;;  %v638_v63 = vcombine.high %v572_v59, %v588_v46 }
  0xd9   :  { %v682_v6 = vand.u32 2147483647, %v2353_v44  ;;  %v2366_v36 = vcombine.high %v484_v49, %v516_v52  ;;  %v685_v45 = vand.u32 2147483647, %v2357_v60  ;;  %v645_v7 = vrot.slane %v637_v39, %v2182_v20 }
  0xda   :  { %v680_v15 = vand.u32 2147483647, %v2339_v26  ;;  %v754_v17 = vsel %vm693_vm0, %v681_v48, -inf  ;;  %v652_v46 = vrot.slane %v638_v63, %v2182_v20 }
  0xdb   :  { %v757_v34 = vsel %vm693_vm0, %v682_v6, -inf  ;;  %v684_v41 = vand.u32 2147483647, %v2366_v36  ;;  %v766_v0 = vsel %vm693_vm0, %v685_v45, -inf  ;;  %v2383_v58 = vcombine.low %v613_v24, %v645_v7 }
  0xdc   :  { %737 = vmax.xlane.f32.xlu1 %v736_v56  ;;  %728 = vmax.xlane.f32.xlu0 %v727_v5  ;;  %v683_v5 = vand.u32 2147483647, %v2343_v61  ;;  %v636_v56 = vrot.slane %v622_v23, %v2182_v20  ;;  %v751_v32 = vsel %vm693_vm0, %v680_v15, -inf  ;;  %v2396_v48 = vcombine.low %v620_v42, %v652_v46 }
  0xdd   :  { %v763_v49 = vsel %vm693_vm0, %v684_v41, -inf  ;;  %v2407_v15 = vcombine.high %v620_v42, %v652_v46 }
  0xde   :  { %v760_v38 = vsel %vm693_vm0, %v683_v5, -inf  ;;  %v2391_v23 = vcombine.high %v604_v40, %v636_v56  ;;  %v691_v43 = vand.u32 2147483647, %v2396_v48 }
  0xdf   :  { %v692_v5 = vand.u32 2147483647, %v2407_v15 }
  0xe0   :  { %734 = vmax.xlane.f32.xlu0 %v733_v4  ;;  %743 = vmax.xlane.f32.xlu1 %v742_v62  ;;  %v2370_v4 = vcombine.low %v604_v40, %v636_v56  ;;  %v2379_v62 = vcombine.high %v597_v37, %v629_v54  ;;  %v2398_v54 = vcombine.high %v613_v24, %v645_v7  ;;  %v688_v35 = vand.u32 2147483647, %v2391_v23 }
  0xe1   :  { %v784_v39 = vsel %vm693_vm0, %v691_v43, -inf  ;;  %v787_v56 = vsel %vm693_vm0, %v692_v5, -inf  ;;  %v1685_v40 = vand.u32 127, %v122_v12 }
  0xe2   :  { %v687_v52 = vand.u32 2147483647, %v2370_v4  ;;  %v686_v29 = vand.u32 2147483647, %v2379_v62  ;;  %v775_v37 = vsel %vm693_vm0, %v688_v35, -inf }
  0xe3   :  { %v2414_v45 = vsub.s32 %v1685_v40, %v2104_v16 }
  0xe4   :  { %740 = vmax.xlane.f32.xlu0 %v739_v30  ;;  %749 = vmax.xlane.f32.xlu1 %v748_v51  ;;  %v772_v30 = vsel %vm693_vm0, %v687_v52, -inf  ;;  %v689_v51 = vand.u32 2147483647, %v2383_v58  ;;  %v769_v59 = vsel %vm693_vm0, %v686_v29, -inf }
  0xe6   :  { %v778_v25 = vsel %vm693_vm0, %v689_v51, -inf }
  0xe8   :  { %746 = vmax.xlane.f32.xlu0 %v745_v47  ;;  %755 = vmax.xlane.f32.xlu1 %v754_v17  ;;  %v690_v47 = vand.u32 2147483647, %v2398_v54 }
  0xea   :  { %v781_v17 = vsel %vm693_vm0, %v690_v47, -inf }
  0xec   :  { %752 = vmax.xlane.f32.xlu0 %v751_v32  ;;  %761 = vmax.xlane.f32.xlu1 %v760_v38 }
  0xf0   :  { %758 = vmax.xlane.f32.xlu0 %v757_v34  ;;  %767 = vmax.xlane.f32.xlu1 %v766_v0 }
  0xf4   :  { %764 = vmax.xlane.f32.xlu0 %v763_v49  ;;  %773 = vmax.xlane.f32.xlu1 %v772_v30 }
  0xf8   :  { %770 = vmax.xlane.f32.xlu0 %v769_v59  ;;  %779 = vmax.xlane.f32.xlu1 %v778_v25 }
  0xfc   :  { %776 = vmax.xlane.f32.xlu0 %v775_v37  ;;  %785 = vmax.xlane.f32.xlu1 %v784_v39 }
 0x100   :  { %782 = vmax.xlane.f32.xlu0 %v781_v17 }
 0x104   :  { %788 = vmax.xlane.f32.xlu0 %v787_v56 }
 0x151   :  { %v699_v63 = vpop.xlane.xlu1 %698  ;;  %v696_v32 = vpop.xlane.xlu0 %695 }
 0x152   :  { %v792_v6 = vmul.f32 0.002232143, %v699_v63  ;;  %v791_v38 = vmul.f32 0.002232143, %v696_v32 }
 0x154   :  { %vm824_vm1 = vcmp.eq.f32.partialorder %v792_v6, 0.0  ;;  %vm823_vm2 = vcmp.eq.f32.partialorder %v791_v38, 0.0  ;;  %v1693_v46 = vrot.slane %v792_v6, %v2414_v45  ;;  %v1689_v12 = vrot.slane %v791_v38, %v2414_v45 }
 0x155   :  { %v856_v7 = vsel %vm824_vm1, 1.0, %v792_v6  ;;  %v708_v24 = vpop.xlane.xlu1 %707  ;;  %v702_v34 = vpop.xlane.xlu0 %701  ;;  %v855_v41 = vsel %vm823_vm2, 1.0, %v791_v38  ;;  %vm1853_vm1 = vcmask 64512  }
 0x156   :  { %v795_v0 = vmul.f32 0.002232143, %v708_v24  ;;  %v793_v52 = vmul.f32 0.002232143, %v702_v34  ;;  %1890 = vrcp.f32 %v856_v7  ;;  %v1815_v25 = vsel %vm1814_vm3, %v1693_v46, %v1689_v12 }
 0x157   :  { %1892 = vrcp.f32 %v855_v41 }
 0x158   :  { %vm827_vm4 = vcmp.eq.f32.partialorder %v795_v0, 0.0  ;;  %vm825_vm5 = vcmp.eq.f32.partialorder %v793_v52, 0.0  ;;  %v1697_v49 = vrot.slane %v793_v52, %v2414_v45  ;;  %v1705_v63 = vrot.slane %v795_v0, %v2414_v45 }
 0x159   :  { %v859_v42 = vsel %vm827_vm4, 1.0, %v795_v0  ;;  %v857_v16 = vsel %vm825_vm5, 1.0, %v793_v52  ;;  %v714_v30 = vpop.xlane.xlu1 %713  ;;  %v705_v29 = vpop.xlane.xlu0 %704 }
 0x15a   :  { %1894 = vrcp.f32 %v859_v42  ;;  %v797_v51 = vmul.f32 0.002232143, %v714_v30  ;;  %v794_v59 = vmul.f32 0.002232143, %v705_v29  ;;  %v1817_v43 = vsel %vm1816_vm6, %v1697_v49, %v1815_v25 }
 0x15b   :  { %1896 = vrcp.f32 %v857_v16 }
 0x15c   :  { %vm829_vm8 = vcmp.eq.f32.partialorder %v797_v51, 0.0  ;;  %vm826_vm9 = vcmp.eq.f32.partialorder %v794_v59, 0.0  ;;  %v1701_v35 = vrot.slane %v794_v59, %v2414_v45  ;;  %v1713_v0 = vrot.slane %v797_v51, %v2414_v45 }
 0x15d   :  { %v861_v37 = vsel %vm829_vm8, 1.0, %v797_v51  ;;  %v858_v39 = vsel %vm826_vm9, 1.0, %v794_v59  ;;  %v720_v47 = vpop.xlane.xlu1 %719  ;;  %v711_v17 = vpop.xlane.xlu0 %710 }
 0x15e   :  { %1898 = vrcp.f32 %v861_v37  ;;  %v1819_v5 = vsel %vm1818_vm7, %v1701_v35, %v1817_v43  ;;  %v799_v56 = vmul.f32 0.002232143, %v720_v47  ;;  %v796_v40 = vmul.f32 0.002232143, %v711_v17 }
 0x15f   :  { %1900 = vrcp.f32 %v858_v39  ;;  %v1821_v6 = vsel %vm1820_vm10, %v1705_v63, %v1819_v5 }
 0x160   :  { %vm831_vm12 = vcmp.eq.f32.partialorder %v799_v56, 0.0  ;;  %vm828_vm13 = vcmp.eq.f32.partialorder %v796_v40, 0.0  ;;  %v1709_v32 = vrot.slane %v796_v40, %v2414_v45  ;;  %v1891_v34 = vpop.eup %1890  ;;  %v1721_v16 = vrot.slane %v799_v56, %v2414_v45 }
 0x161   :  { %v860_v38 = vsel %vm828_vm13, 1.0, %v796_v40  ;;  %v726_v7 = vpop.xlane.xlu1 %725  ;;  %v717_v24 = vpop.xlane.xlu0 %716  ;;  %v863_v41 = vsel %vm831_vm12, 1.0, %v799_v56  ;;  %v2432_v37 = vmul.f32 %v1891_v34, %v2205_v18 }
 0x162   :  { %v1823_v52 = vsel %vm1822_vm11, %v1709_v32, %v1821_v6  ;;  %v801_v46 = vmul.f32 0.002232143, %v726_v7  ;;  %v798_v12 = vmul.f32 0.002232143, %v717_v24  ;;  %v1893_v42 = vpop.eup %1892  ;;  %1902 = vrcp.f32 %v860_v38 }
 0x163   :  { %1904 = vrcp.f32 %v863_v41  ;;  %v1825_v59 = vsel %vm1824_vm14, %v1713_v0, %v1823_v52  ;;  %v2441_v56 = vmul.f32 %v1893_v42, %v2207_v1 }
 0x164   :  { %v1895_v49 = vpop.eup %1894  ;;  %vm833_vm2 = vcmp.eq.f32.partialorder %v801_v46, 0.0  ;;  %vm830_vm4 = vcmp.eq.f32.partialorder %v798_v12, 0.0  ;;  %v1717_v30 = vrot.slane %v798_v12, %v2414_v45  ;;  %v1729_v5 = vrot.slane %v801_v46, %v2414_v45 }
 0x165   :  { %v1897_v29 = vpop.eup %1896  ;;  %v862_v25 = vsel %vm830_vm4, 1.0, %v798_v12  ;;  %v732_v35 = vpop.xlane.xlu1 %731  ;;  %v865_v51 = vsel %vm833_vm2, 1.0, %v801_v46  ;;  %v2448_v32 = vmul.f32 %v1895_v49, %v2209_v9 }
 0x166   :  { %v723_v43 = vpop.xlane.xlu0 %722  ;;  %v1827_v39 = vsel %vm1826_vm15, %v1717_v30, %v1825_v59  ;;  %v803_v47 = vmul.f32 0.002232143, %v732_v35  ;;  %1906 = vrcp.f32 %v862_v25  ;;  %v2444_v40 = vmul.f32 %v1897_v29, %v2211_v19 }
 0x167   :  { %v800_v17 = vmul.f32 0.002232143, %v723_v43  ;;  %1854 = vst.msk [vmem:[%s2919_s2] sm:$0xff] %vm1853_vm1, %v1827_v39  ;;  %1908 = vrcp.f32 %v865_v51 }
 0x168   :  { %v1899_v18 = vpop.eup %1898  ;;  %vm835_vm5 = vcmp.eq.f32.partialorder %v803_v47, 0.0  ;;  %v951_v1 = vcombine.low %v2441_v56, %v2444_v40  ;;  %v1737_v46 = vrot.slane %v803_v47, %v2414_v45 }
 0x169   :  { %vm832_vm8 = vcmp.eq.f32.partialorder %v800_v17, 0.0  ;;  %v1725_v63 = vrot.slane %v800_v17, %v2414_v45  ;;  %v1901_v6 = vpop.eup %1900  ;;  %v867_v38 = vsel %vm835_vm5, 1.0, %v803_v47  ;;  %v738_v24 = vpop.xlane.xlu1 %737  ;;  %v2458_v12 = vmul.f32 %v1899_v18, %v2225_v8 }
 0x16a   :  { %v864_v7 = vsel %vm832_vm8, 1.0, %v800_v17  ;;  %v729_v34 = vpop.xlane.xlu0 %728  ;;  %1910 = vrcp.f32 %v867_v38  ;;  %v805_v41 = vmul.f32 0.002232143, %v738_v24  ;;  %v2455_v9 = vmul.f32 %v1901_v6, %v2229_v55 }
 0x16b   :  { %v1828_v19 = vsel %vm1814_vm3, %v1725_v63, %v1721_v16  ;;  %v802_v52 = vmul.f32 0.002232143, %v729_v34  ;;  %1912 = vrcp.f32 %v864_v7  ;;  %v2463_v59 = vrot.slane %v951_v1, %v2109_v21 }
 0x16c   :  { %vm837_vm9 = vcmp.eq.f32.partialorder %v805_v41, 0.0  ;;  %v1829_v42 = vsel %vm1816_vm6, %v1729_v5, %v1828_v19  ;;  %v967_v55 = vcombine.low %v2432_v37, %v2455_v9  ;;  %v1903_v25 = vpop.eup %1902  ;;  %v1745_v39 = vrot.slane %v805_v41, %v2414_v45 }
 0x16d   :  { %vm834_vm12 = vcmp.eq.f32.partialorder %v802_v52, 0.0  ;;  %v1733_v0 = vrot.slane %v802_v52, %v2414_v45  ;;  %v869_v49 = vsel %vm837_vm9, 1.0, %v805_v41  ;;  %v744_v16 = vpop.xlane.xlu1 %743  ;;  %v1905_v51 = vpop.eup %1904  ;;  %v983_v17 = vcombine.low %v2448_v32, %v2458_v12 }
 0x16e   :  { %v866_v30 = vsel %vm834_vm12, 1.0, %v802_v52  ;;  %v735_v29 = vpop.xlane.xlu0 %734  ;;  %1914 = vrcp.f32 %v869_v49  ;;  %v2468_v35 = vmul.f32 0.002232143, %v744_v16  ;;  %v2472_v47 = vrot.slane %v967_v55, %v2109_v21 }
 0x16f   :  { %v1830_v8 = vsel %vm1818_vm7, %v1733_v0, %v1829_v42  ;;  %v804_v43 = vmul.f32 0.002232143, %v735_v29  ;;  %1916 = vrcp.f32 %v866_v30  ;;  %v2481_v34 = vmul.f32 %v1903_v25, %v2239_v10 }
 0x170   :  { %vm839_vm13 = vcmp.eq.f32.partialorder %v2468_v35, 0.0  ;;  %v1831_v5 = vsel %vm1820_vm10, %v1737_v46, %v1830_v8  ;;  %v1907_v63 = vpop.eup %1906  ;;  %v1015_v1 = vcombine.low %v2463_v59, %v2472_v47  ;;  %v1753_v42 = vrot.slane %v2468_v35, %v2414_v45 }
 0x171   :  { %vm836_vm2 = vcmp.eq.f32.partialorder %v804_v43, 0.0  ;;  %v1741_v18 = vrot.slane %v804_v43, %v2414_v45  ;;  %v871_v6 = vsel %vm839_vm13, 1.0, %v2468_v35  ;;  %v750_v7 = vpop.xlane.xlu1 %749  ;;  %v1909_v46 = vpop.eup %1908  ;;  %v2489_v0 = vmul.f32 %v1907_v63, %v2252_v28 }
 0x172   :  { %v868_v38 = vsel %vm836_vm2, 1.0, %v804_v43  ;;  %v741_v24 = vpop.xlane.xlu0 %740  ;;  %1918 = vrcp.f32 %v871_v6  ;;  %v809_v41 = vmul.f32 0.002232143, %v750_v7  ;;  %v2492_v49 = vrot.slane %v983_v17, %v2109_v21 }
 0x173   :  { %v1832_v19 = vsel %vm1822_vm11, %v1741_v18, %v1831_v5  ;;  %v806_v52 = vmul.f32 0.002232143, %v741_v24  ;;  %1920 = vrcp.f32 %v868_v38  ;;  %v999_v35 = vcombine.low %v2481_v34, %v2489_v0 }
 0x174   :  { %v1911_v10 = vpop.eup %1910  ;;  %vm841_vm4 = vcmp.eq.f32.partialorder %v809_v41, 0.0  ;;  %v1833_v30 = vsel %vm1824_vm14, %v1745_v39, %v1832_v19  ;;  %v2499_v28 = vrot.slane %v1015_v1, %v2182_v20  ;;  %v1761_v39 = vrot.slane %v809_v41, %v2414_v45 }
 0x175   :  { %vm838_vm5 = vcmp.eq.f32.partialorder %v806_v52, 0.0  ;;  %v1749_v16 = vrot.slane %v806_v52, %v2414_v45  ;;  %v1913_v29 = vpop.eup %1912  ;;  %v873_v55 = vsel %vm841_vm4, 1.0, %v809_v41  ;;  %v756_v8 = vpop.xlane.xlu1 %755  ;;  %v2508_v63 = vrot.slane %v999_v35, %v2109_v21 }
 0x176   :  { %v870_v25 = vsel %vm838_vm5, 1.0, %v806_v52  ;;  %v747_v43 = vpop.xlane.xlu0 %746  ;;  %2927 = vst [vmem:[#allocation8_spill] sm:$0xff] %v2499_v28  ;;  %1922 = vrcp.f32 %v873_v55  ;;  %v811_v5 = vmul.f32 0.002232143, %v756_v8  ;;  %v2511_v6 = vmul.f32 %v1905_v51, %v2243_v22 }
 0x177   :  { %v1834_v17 = vsel %vm1826_vm15, %v1749_v16, %v1833_v30  ;;  %v808_v18 = vmul.f32 0.002232143, %v747_v43  ;;  %1924 = vrcp.f32 %v870_v25  ;;  %v2515_v24 = vmul.f32 %v1913_v29, %v2264_v11 }
 0x178   :  { %1855 = vst.msk [vmem:[%s2919_s2 + $0x8] sm:$0xff] %vm1853_vm1, %v1834_v17  ;;  %2928 = vst [vmem:[#allocation9_spill] sm:$0xff] %v2511_v6  ;;  %v1915_v38 = vpop.eup %1914  ;;  %vm843_vm8 = vcmp.eq.f32.partialorder %v811_v5, 0.0  ;;  %v1047_v16 = vcombine.low %v2492_v49, %v2508_v63  ;;  %v2520_v55 = vmul.f32 %v1909_v46, %v2256_v3  ;;  %v1769_v8 = vrot.slane %v811_v5, %v2414_v45 }
 0x179   :  { %vm840_vm9 = vcmp.eq.f32.partialorder %v808_v18, 0.0  ;;  %v1757_v7 = vrot.slane %v808_v18, %v2414_v45  ;;  %v1917_v1 = vpop.eup %1916  ;;  %v875_v19 = vsel %vm843_vm8, 1.0, %v811_v5  ;;  %v762_v52 = vpop.xlane.xlu1 %761  ;;  %v2528_v29 = vmul.f32 %v1911_v10, %v2268_v14 }
 0x17a   :  { %v872_v41 = vsel %vm840_vm9, 1.0, %v808_v18  ;;  %v753_v30 = vpop.xlane.xlu0 %752  ;;  %2929 = vst [vmem:[#allocation10_spill] sm:$0xff] %v2520_v55  ;;  %1926 = vrcp.f32 %v875_v19  ;;  %v813_v51 = vmul.f32 0.002232143, %v762_v52  ;;  %v2525_v11 = vrot.slane %v1047_v16, %v2182_v20 }
 0x17b   :  { %v1835_v22 = vsel %vm1814_vm3, %v1757_v7, %v1753_v42  ;;  %v810_v25 = vmul.f32 0.002232143, %v753_v30  ;;  %1928 = vrcp.f32 %v872_v41  ;;  %2931 = vst [vmem:[#allocation12_spill] sm:$0xff] %v2528_v29  ;;  %v2537_v19 = vmul.f32 %v1917_v1, %v2277_v33 }
 0x17c   :  { %2930 = vst [vmem:[#allocation11_spill] sm:$0xff] %v2525_v11  ;;  %v2530_v43 = vpop.eup %1918  ;;  %vm845_vm12 = vcmp.eq.f32.partialorder %v813_v51, 0.0  ;;  %v1836_v3 = vsel %vm1816_vm6, %v1761_v39, %v1835_v22  ;;  %v1080_v5 = vcombine.high %v2499_v28, %v2525_v11  ;;  %v1777_v41 = vrot.slane %v813_v51, %v2414_v45 }
 0x17d   :  { %vm842_vm13 = vcmp.eq.f32.partialorder %v810_v25, 0.0  ;;  %v1765_v46 = vrot.slane %v810_v25, %v2414_v45  ;;  %v1921_v42 = vpop.eup %1920  ;;  %v877_v35 = vsel %vm845_vm12, 1.0, %v813_v51  ;;  %v768_v18 = vpop.xlane.xlu1 %767  ;;  %v2545_v52 = vmul.f32 %v1915_v38, %v2281_v27 }
 0x17e   :  { %v874_v17 = vsel %vm842_vm13, 1.0, %v810_v25  ;;  %v759_v7 = vpop.xlane.xlu0 %758  ;;  %1930 = vrcp.f32 %v877_v35  ;;  %v2540_v10 = vmul.f32 0.002232143, %v768_v18  ;;  %1499 = vrot.lane.b32.xlu1 %v1080_v5, %s2011_s28  ;;  %v1087_v30 = vcombine.low %v2511_v6, %v2520_v55 }
 0x17f   :  { %v1837_v14 = vsel %vm1818_vm7, %v1765_v46, %v1836_v3  ;;  %v812_v39 = vmul.f32 0.002232143, %v759_v7  ;;  %1932 = vrcp.f32 %v874_v17  ;;  %v2556_v27 = vmul.f32 %v1921_v42, %v2292_v13 }
 0x180   :  { %v2549_v16 = vpop.eup %1922  ;;  %vm847_vm2 = vcmp.eq.f32.partialorder %v2540_v10, 0.0  ;;  %v1838_v33 = vsel %vm1820_vm10, %v1769_v8, %v1837_v14  ;;  %v1103_v38 = vcombine.low %v2515_v24, %v2537_v19  ;;  %v1785_v35 = vrot.slane %v2540_v10, %v2414_v45 }
 0x181   :  { %vm844_vm4 = vcmp.eq.f32.partialorder %v812_v39, 0.0  ;;  %v1773_v1 = vrot.slane %v812_v39, %v2414_v45  ;;  %v1925_v22 = vpop.eup %1924  ;;  %v879_v51 = vsel %vm847_vm2, 1.0, %v2540_v10  ;;  %v774_v3 = vpop.xlane.xlu1 %773  ;;  %v2567_v7 = vrot.slane %v1087_v30, %v2109_v21 }
 0x182   :  { %v876_v25 = vsel %vm844_vm4, 1.0, %v812_v39  ;;  %v765_v46 = vpop.xlane.xlu0 %764  ;;  %v817_v17 = vmul.f32 0.002232143, %v774_v3  ;;  %1934 = vrcp.f32 %v879_v51  ;;  %v2564_v5 = vmul.f32 %v1925_v22, %v2308_v53 }
 0x183   :  { %v1839_v8 = vsel %vm1822_vm11, %v1773_v1, %v1838_v33  ;;  %v814_v18 = vmul.f32 0.002232143, %v765_v46  ;;  %v2570_v13 = vrot.slane %v1103_v38, %v2109_v21  ;;  %1936 = vrcp.f32 %v876_v25 }
 0x184   :  { %v2572_v42 = vpop.eup %1926  ;;  %vm849_vm5 = vcmp.eq.f32.partialorder %v817_v17, 0.0  ;;  %v1840_v39 = vsel %vm1824_vm14, %v1777_v41, %v1839_v8  ;;  %v1119_v30 = vcombine.low %v2528_v29, %v2545_v52  ;;  %v1135_v22 = vcombine.low %v2556_v27, %v2564_v5 }
 0x185   :  { %vm846_vm8 = vcmp.eq.f32.partialorder %v814_v18, 0.0  ;;  %v1781_v14 = vrot.slane %v814_v18, %v2414_v45  ;;  %v2575_v10 = vpop.eup %1928  ;;  %v780_v53 = vpop.xlane.xlu1 %779  ;;  %v881_v51 = vsel %vm849_vm5, 1.0, %v817_v17  ;;  %v1151_v8 = vcombine.low %v2567_v7, %v2570_v13 }
 0x186   :  { %v878_v33 = vsel %vm846_vm8, 1.0, %v814_v18  ;;  %v771_v1 = vpop.xlane.xlu0 %770  ;;  %v819_v3 = vmul.f32 0.002232143, %v780_v53  ;;  %v2588_v41 = vrot.slane %v1119_v30, %v2109_v21  ;;  %v2591_v38 = vrot.slane %v1135_v22, %v2109_v21 }
 0x187   :  { %v1841_v25 = vsel %vm1826_vm15, %v1781_v14, %v1840_v39  ;;  %v816_v46 = vmul.f32 0.002232143, %v771_v1  ;;  %1938 = vrcp.f32 %v878_v33  ;;  %v1793_v14 = vrot.slane %v817_v17, %v2414_v45 }
 0x188   :  { %1856 = vst.msk [vmem:[%s2919_s2 + $0x10] sm:$0xff] %vm1853_vm1, %v1841_v25  ;;  %v1931_v18 = vpop.eup %1930  ;;  %vm851_vm9 = vcmp.eq.f32.partialorder %v819_v3, 0.0  ;;  %1940 = vrcp.f32 %v881_v51  ;;  %v1183_v22 = vcombine.low %v2588_v41, %v2591_v38  ;;  %v1801_v6 = vrot.slane %v819_v3, %v2414_v45 }
 0x189   :  { %vm848_vm12 = vcmp.eq.f32.partialorder %v816_v46, 0.0  ;;  %v1789_v39 = vrot.slane %v816_v46, %v2414_v45  ;;  %v1933_v33 = vpop.eup %1932  ;;  %v883_v53 = vsel %vm851_vm9, 1.0, %v819_v3  ;;  %v786_v25 = vpop.xlane.xlu1 %785  ;;  %v2602_v17 = vrot.slane %v1151_v8, %v2182_v20 }
 0x18a   :  { %v880_v1 = vsel %vm848_vm12, 1.0, %v816_v46  ;;  %v777_v30 = vpop.xlane.xlu0 %776  ;;  %v821_v28 = vmul.f32 0.002232143, %v786_v25  ;;  %1942 = vrcp.f32 %v883_v53  ;;  %v2605_v29 = vrot.slane %v1183_v22, %v2182_v20 }
 0x18b   :  { %v1842_v55 = vsel %vm1814_vm3, %v1789_v39, %v1785_v35  ;;  %v818_v11 = vmul.f32 0.002232143, %v777_v30  ;;  %v1016_v51 = vcombine.high %v2463_v59, %v2472_v47  ;;  %1944 = vrcp.f32 %v880_v1 }
 0x18c   :  { %vm853_vm13 = vcmp.eq.f32.partialorder %v821_v28, 0.0  ;;  %v2610_v3 = vpop.eup %1934  ;;  %v1843_v39 = vsel %vm1816_vm6, %v1793_v14, %v1842_v55  ;;  %v1216_v8 = vcombine.high %v2602_v17, %v2605_v29  ;;  %v1048_v47 = vcombine.high %v2492_v49, %v2508_v63 }
 0x18d   :  { %vm850_vm2 = vcmp.eq.f32.partialorder %v818_v11, 0.0  ;;  %v1797_v46 = vrot.slane %v818_v11, %v2414_v45  ;;  %v885_v35 = vsel %vm853_vm13, 1.0, %v821_v28  ;;  %v1937_v30 = vpop.eup %1936  ;;  %v1809_v1 = vrot.slane %v821_v28, %v2414_v45 }
 0x18e   :  { %v882_v53 = vsel %vm850_vm2, 1.0, %v818_v11  ;;  %v783_v25 = vpop.xlane.xlu0 %782  ;;  %1946 = vrcp.f32 %v885_v35  ;;  %1501 = vrot.lane.b32.xlu0 %v1216_v8, %s2011_s28  ;;  %v2622_v11 = vrot.slane %v1016_v51, %v2182_v20  ;;  %v2626_v35 = vrot.slane %v1048_v47, %v2182_v20 }
 0x18f   :  { %v1844_v22 = vsel %vm1818_vm7, %v1797_v46, %v1843_v39  ;;  %v820_v59 = vmul.f32 0.002232143, %v783_v25  ;;  %1948 = vrcp.f32 %v882_v53  ;;  %v2630_v46 = vmul.f32 %v2549_v16, %v2312_v31 }
 0x190   :  { %v1845_v55 = vsel %vm1820_vm10, %v1801_v6, %v1844_v22  ;;  %v2634_v39 = vmul.f32 %v2530_v43, %v2296_v2  ;;  %v2638_v6 = vmul.f32 %v2575_v10, %v2323_v57  ;;  %v2641_v51 = vmul.f32 %v1933_v33, %v2339_v26 }
 0x191   :  { %vm852_vm3 = vcmp.eq.f32.partialorder %v820_v59, 0.0  ;;  %v1805_v14 = vrot.slane %v820_v59, %v2414_v45  ;;  %v1939_v49 = vpop.eup %1938  ;;  %v1081_v31 = vcombine.low %v2622_v11, %v2626_v35  ;;  %v2648_v8 = vmul.f32 %v2572_v42, %v2327_v50 }
 0x192   :  { %v884_v28 = vsel %vm852_vm3, 1.0, %v820_v59  ;;  %v789_v63 = vpop.xlane.xlu0 %788  ;;  %v1941_v25 = vpop.eup %1940  ;;  %v940_v2 = vmul.f32 %v1937_v30, %v2353_v44  ;;  %v2652_v43 = vmul.f32 %v1931_v18, %v2343_v61  ;;  %v942_v57 = vmul.f32 %v1939_v49, %v2366_v36 }
 0x193   :  { %v1846_v53 = vsel %vm1822_vm11, %v1805_v14, %v1845_v55  ;;  %v822_v16 = vmul.f32 0.002232143, %v789_v63  ;;  %v1223_v26 = vcombine.low %v2634_v39, %v2630_v46  ;;  %1950 = vrcp.f32 %v884_v28  ;;  %1515 = vrot.lane.b32.xlu0 %v1081_v31, %s2010_s27 }
 0x194   :  { %v1239_v50 = vcombine.low %v2638_v6, %v2641_v51  ;;  %v1943_v42 = vpop.eup %1942  ;;  %v1847_v44 = vsel %vm1824_vm14, %v1809_v1, %v1846_v53  ;;  %v1255_v61 = vcombine.low %v2648_v8, %v2652_v43  ;;  %v1271_v36 = vcombine.low %v940_v2, %v942_v57 }
 0x195   :  { %vm854_vm6 = vcmp.eq.f32.partialorder %v822_v16, 0.0  ;;  %v1813_v10 = vrot.slane %v822_v16, %v2414_v45  ;;  %v1945_v18 = vpop.eup %1944  ;;  %v1231_v22 = vrot.slane %v1223_v26, %v2109_v21  ;;  %v1000_v49 = vcombine.high %v2481_v34, %v2489_v0 }
 0x196   :  { %v886_v33 = vsel %vm854_vm6, 1.0, %v822_v16  ;;  %v1247_v59 = vrot.slane %v1239_v50, %v2109_v21  ;;  %v1263_v45 = vrot.slane %v1255_v61, %v2109_v21  ;;  %v1279_v47 = vrot.slane %v1271_v36, %v2109_v21 }
 0x197   :  { %1952 = vrcp.f32 %v886_v33  ;;  %v1848_v30 = vsel %vm1826_vm15, %v1813_v10, %v1847_v44  ;;  %v984_v31 = vcombine.high %v2448_v32, %v2458_v12  ;;  %v952_v26 = vcombine.high %v2441_v56, %v2444_v40 }
 0x198   :  { %1857 = vst.msk [vmem:[%s2919_s2 + $0x18] sm:$0xff] %vm1853_vm1, %v1848_v30  ;;  %v1947_v1 = vpop.eup %1946  ;;  %v1288_v55 = vcombine.high %v1231_v22, %v1247_v59  ;;  %v1287_v14 = vcombine.low %v1231_v22, %v1247_v59  ;;  %v1320_v63 = vcombine.high %v1263_v45, %v1279_v47  ;;  %v1319_v53 = vcombine.low %v1263_v45, %v1279_v47  ;;  %s2014_s2 = smov [#allocation5]  }
 0x199   :  { %v1949_v28 = vpop.eup %1948  ;;  %v968_v10 = vcombine.high %v2432_v37, %v2455_v9  ;;  %v2690_v0 = vrot.slane %v1000_v49, %v2109_v21  ;;  %v1272_v32 = vcombine.high %v940_v2, %v942_v57  ;;  %v1082_v56 = vcombine.high %v2622_v11, %v2626_v35  ;;  %s1864_s9 = sshll.u32 %s2014_s2, 4  ;;  %s1865_s9 = int_to_ptr.vmem [resolvable:$true] %s1864_s9 }
 0x19a   :  { %v1302_v16 = vrot.slane %v1288_v55, %v2182_v20  ;;  %v1334_v50 = vrot.slane %v1320_v63, %v2182_v20  ;;  %v2684_v44 = vrot.slane %v1287_v14, %v2182_v20  ;;  %v2687_v34 = vrot.slane %v1319_v53, %v2182_v20  ;;  %s1976_s10 = scalar_lea.vmem %s1865_s9, 128  ;;  %p1981_p9 = scmp.lt.s32.totalorder %s1865_s9, %s1865_s9 }
 0x19b   :  { %v2697_v37 = vrot.slane %v984_v31, %v2109_v21  ;;  %v2700_v9 = vrot.slane %v952_v26, %v2109_v21  ;;  %v2703_v61 = vrot.slane %v968_v10, %v2109_v21  ;;  %v1224_v2 = vcombine.high %v2634_v39, %v2630_v46  ;;  %p1977_p8 = scmp.ne.s32.totalorder %s1865_s9, %s1976_s10  ;;  %p1982_p10 = scmp.lt.s32.totalorder %s1976_s10, %s1976_s10 }
 0x19c   :  { %v1353_v12 = vcombine.low %v1302_v16, %v1334_v50  ;;  %v1352_v33 = vcombine.high %v2684_v44, %v2687_v34  ;;  %v1240_v57 = vcombine.high %v2638_v6, %v2641_v51  ;;  %v1256_v35 = vcombine.high %v2648_v8, %v2652_v43 }
 0x19d   :  { %v1951_v40 = vpop.eup %1950  ;;  %v1063_v11 = vcombine.low %v2697_v37, %v2690_v0  ;;  %v2716_v36 = vmul.f32 %v1941_v25, %v2370_v4  ;;  %v2719_v22 = vrot.slane %v1272_v32, %v2109_v21  ;;  %v2723_v46 = vmul.f32 %v2610_v3, %v2357_v60  ;;  %p1983_p11 = por %p1982_p10, %p1981_p9 }
 0x19e   :  { %1519 = vrot.lane.b32.xlu0 %v1353_v12, %s2010_s27  ;;  %1503 = vrot.lane.b32.xlu1 %v1352_v33, %s2011_s28  ;;  %v2726_v39 = vmul.f32 %v1945_v18, %v2379_v62  ;;  %v2729_v6 = vmul.f32 %v1949_v28, %v2391_v23  ;;  %v2732_v51 = vmul.f32 %v1943_v42, %v2383_v58  ;;  %vm1611_vm7 = vcmask 261120  }
 0x19f   :  { %v2735_v4 = vmul.f32 %v1951_v40, %v2398_v54  ;;  %v2738_v8 = vmul.f32 %v1947_v1, %v2396_v48  ;;  %v1031_v60 = vcombine.low %v2700_v9, %v2703_v61  ;;  %v1359_v62 = vcombine.low %v2723_v46, %v2716_v36  ;;  %p1984_p12 = pnand %p1983_p11, %p1977_p8 }
 0x1a0   :  { %v1375_v23 = vcombine.low %v2726_v39, %v2729_v6  ;;  %v2751_v58 = vrot.slane %v1240_v57, %v2109_v21  ;;  %v2754_v48 = vrot.slane %v1256_v35, %v2109_v21  ;;  %v1071_v3 = vrot.slane %v1063_v11, %v2182_v20 }
 0x1a1   :  { %v1953_v30 = vpop.eup %1952  ;;  %v1391_v54 = vcombine.low %v2732_v51, %v2738_v8  ;;  %v2762_v43 = vrot.slane %v1224_v2, %v2109_v21  ;;  %v1367_v42 = vrot.slane %v1359_v62, %v2109_v21  ;;  %v1354_v59 = vcombine.high %v1302_v16, %v1334_v50 }
 0x1a2   :  { %v2741_v25 = vmul.f32 %v1953_v30, %v2407_v15  ;;  %1531 = vrot.lane.b32.xlu0 %v1082_v56, %s2009_s26  ;;  %v1383_v18 = vrot.slane %v1375_v23, %v2109_v21  ;;  %v1335_v45 = vcombine.low %v2754_v48, %v2719_v22  ;;  %v1039_v55 = vrot.slane %v1031_v60, %v2182_v20  ;;  %v2932_v30 = vld [vmem:[#allocation12_spill] sm:$0xff]  ;;  %v2933_v23 = vld [vmem:[#allocation11_spill] sm:$0xff] }
 0x1a3   :  { %v1399_v47 = vrot.slane %v1391_v54, %v2109_v21  ;;  %v1303_v49 = vcombine.low %v2762_v43, %v2751_v58  ;;  %v1184_v63 = vcombine.high %v2588_v41, %v2591_v38  ;;  %v1152_v10 = vcombine.high %v2567_v7, %v2570_v13  ;;  %v2934_v54 = vld [vmem:[#allocation8_spill] sm:$0xff] }
 0x1a4   :  { %v1407_v15 = vcombine.low %v2735_v4, %v2741_v25  ;;  %v1423_v14 = vcombine.low %v1367_v42, %v1383_v18  ;;  %v1083_v53 = vcombine.low %v1039_v55, %v1071_v3  ;;  %v1343_v31 = vrot.slane %v1335_v45, %v2182_v20 }
 0x1a5   :  { %v1311_v50 = vrot.slane %v1303_v49, %v2182_v20  ;;  %v1198_v41 = vrot.slane %v1184_v63, %v2182_v20  ;;  %v1166_v33 = vrot.slane %v1152_v10, %v2182_v20  ;;  %v1424_v56 = vcombine.high %v1367_v42, %v1383_v18 }
 0x1a6   :  { %v1415_v1 = vrot.slane %v1407_v15, %v2109_v21  ;;  %1535 = vrot.lane.b32.xlu0 %v1354_v59, %s2009_s26  ;;  %v2778_v16 = vrot.slane %v1423_v14, %v2182_v20  ;;  %v1136_v13 = vcombine.high %v2556_v27, %v2564_v5  ;;  %v1064_v2 = vcombine.high %v2697_v37, %v2690_v0  ;;  %v2935_v37 = vld [vmem:[#allocation10_spill] sm:$0xff]  ;;  %v2936_v15 = vld [vmem:[#allocation9_spill] sm:$0xff] }
 0x1a7   :  { %v1355_v12 = vcombine.low %v1311_v50, %v1343_v31  ;;  %v1217_v40 = vcombine.low %v1166_v33, %v1198_v41  ;;  %v1084_v57 = vcombine.high %v1039_v55, %v1071_v3  ;;  %v1438_v11 = vrot.slane %v1424_v56, %v2182_v20 }
 0x1a8   :  { %v1455_v28 = vcombine.low %v1399_v47, %v1415_v1  ;;  %v1456_v38 = vcombine.high %v1399_v47, %v1415_v1  ;;  %v1104_v35 = vcombine.high %v2515_v24, %v2537_v19  ;;  %v1120_v60 = vcombine.high %v2932_v30, %v2545_v52 }
 0x1a9   :  { %v1032_v62 = vcombine.high %v2700_v9, %v2703_v61  ;;  %v1079_v27 = vcombine.low %v2934_v54, %v2933_v23  ;;  %v1215_v5 = vcombine.low %v2602_v17, %v2605_v29  ;;  %v1088_v3 = vcombine.high %v2936_v15, %v2935_v37 }
 0x1aa   :  { %v2781_v26 = vrot.slane %v1455_v28, %v2182_v20  ;;  %1547 = vrot.lane.b32.xlu0 %v1083_v53, %s2008_s25  ;;  %v1470_v7 = vrot.slane %v1456_v38, %v2182_v20  ;;  %v1150_v24 = vrot.slane %v1136_v13, %v2109_v21  ;;  %v1408_v19 = vcombine.high %v2735_v4, %v2741_v25 }
 0x1ab   :  { %v1356_v52 = vcombine.high %v1311_v50, %v1343_v31  ;;  %v1078_v9 = vrot.slane %v1064_v2, %v2182_v20  ;;  %v1336_v61 = vcombine.high %v2754_v48, %v2719_v22  ;;  %v1351_v42 = vcombine.low %v2684_v44, %v2687_v34 }
 0x1ac   :  { %v1488_v32 = vcombine.high %v2778_v16, %v2781_v26  ;;  %v1489_v0 = vcombine.low %v1438_v11, %v1470_v7  ;;  %v1118_v18 = vrot.slane %v1104_v35, %v2109_v21  ;;  %v1134_v59 = vrot.slane %v1120_v60, %v2109_v21 }
 0x1ad   :  { %v1376_v45 = vcombine.high %v2726_v39, %v2729_v6  ;;  %v1392_v4 = vcombine.high %v2732_v51, %v2738_v8  ;;  %v1046_v25 = vrot.slane %v1032_v62, %v2182_v20  ;;  %v1218_v47 = vcombine.high %v1166_v33, %v1198_v41 }
 0x1ae   :  { %1505 = vrot.lane.b32.xlu1 %v1488_v32, %s2011_s28  ;;  %1551 = vrot.lane.b32.xlu0 %v1355_v12, %s2008_s25  ;;  %v1304_v22 = vcombine.high %v2762_v43, %v2751_v58  ;;  %v1487_v48 = vcombine.low %v2778_v16, %v2781_v26  ;;  %v1102_v1 = vrot.slane %v1088_v3, %v2109_v21  ;;  %vm1616_vm10 = vcmask 392192  }
 0x1af   :  { %v1199_v55 = vcombine.low %v1134_v59, %v1150_v24  ;;  %v1360_v39 = vcombine.high %v2723_v46, %v2716_v36  ;;  %v1422_v6 = vrot.slane %v1408_v19, %v2109_v21  ;;  %v1085_v51 = vcombine.low %v1046_v25, %v1078_v9 }
 0x1b0   :  { %v1350_v8 = vrot.slane %v1336_v61, %v2182_v20  ;;  %v1167_v14 = vcombine.low %v1102_v1, %v1118_v18  ;;  %v1390_v58 = vrot.slane %v1376_v45, %v2109_v21  ;;  %v1406_v43 = vrot.slane %v1392_v4, %v2109_v21 }
 0x1b1   :  { %v1318_v49 = vrot.slane %v1304_v22, %v2182_v20  ;;  %v1490_v28 = vcombine.high %v1438_v11, %v1470_v7  ;;  %v1207_v63 = vrot.slane %v1199_v55, %v2182_v20  ;;  %v1374_v36 = vrot.slane %v1360_v39, %v2109_v21 }
 0x1b2   :  { %1517 = vrot.lane.b32.xlu1 %v1217_v40, %s2010_s27  ;;  %1563 = vrot.lane.b32.xlu0 %v1084_v57, %s2007_s24  ;;  %v1471_v46 = vcombine.low %v1406_v43, %v1422_v6  ;;  %v1175_v31 = vrot.slane %v1167_v14, %v2182_v20  ;;  %v1086_v41 = vcombine.high %v1046_v25, %v1078_v9  ;;  %vm1621_vm11 = vcmask 523264  }
 0x1b3   :  { %v1357_v53 = vcombine.low %v1318_v49, %v1350_v8  ;;  %v1439_v10 = vcombine.low %v1374_v36, %v1390_v58  ;;  %v1358_v12 = vcombine.high %v1318_v49, %v1350_v8  ;;  %v1200_v56 = vcombine.high %v1134_v59, %v1150_v24 }
 0x1b4   :  { %v1219_v50 = vcombine.low %v1175_v31, %v1207_v63  ;;  %v1479_v32 = vrot.slane %v1471_v46, %v2182_v20  ;;  %v1220_v33 = vcombine.high %v1175_v31, %v1207_v63  ;;  %v1168_v40 = vcombine.high %v1102_v1, %v1118_v18 }
 0x1b5   :  { %v1447_v38 = vrot.slane %v1439_v10, %v2182_v20  ;;  %v1214_v13 = vrot.slane %v1200_v56, %v2182_v20  ;;  %v1472_v2 = vcombine.high %v1406_v43, %v1422_v6  ;;  %v1440_v11 = vcombine.high %v1374_v36, %v1390_v58 }
 0x1b6   :  { %1521 = vrot.lane.b32.xlu1 %v1489_v0, %s2010_s27  ;;  %1567 = vrot.lane.b32.xlu0 %v1356_v52, %s2007_s24  ;;  %v1182_v57 = vrot.slane %v1168_v40, %v2182_v20  ;;  %vm1626_vm14 = vcmask 654336   ;;  %vm1631_vm15 = vcmask 785408   ;;  %vm1636_vm1 = vcmask 916480  }
 0x1b7   :  { %v1491_v21 = vcombine.low %v1447_v38, %v1479_v32  ;;  %v1492_v7 = vcombine.high %v1447_v38, %v1479_v32  ;;  %v1486_v30 = vrot.slane %v1472_v2, %v2182_v20  ;;  %v1454_v60 = vrot.slane %v1440_v11, %v2182_v20 }
 0x1b8   :  { %v1221_v35 = vcombine.low %v1182_v57, %v1214_v13  ;;  %v1222_v0 = vcombine.high %v1182_v57, %v1214_v13 }
 0x1b9   :  { %v1493_v62 = vcombine.low %v1454_v60, %v1486_v30  ;;  %v1494_v37 = vcombine.high %v1454_v60, %v1486_v30 }
 0x1ba   :  { %1533 = vrot.lane.b32.xlu1 %v1218_v47, %s2009_s26  ;;  %1579 = vrot.lane.b32.xlu0 %v1085_v51, %s2006_s0 }
 0x1be   :  { %1537 = vrot.lane.b32.xlu1 %v1490_v28, %s2009_s26  ;;  %1583 = vrot.lane.b32.xlu0 %v1357_v53, %s2006_s0 }
 0x1c2   :  { %1549 = vrot.lane.b32.xlu1 %v1219_v50, %s2008_s25  ;;  %1595 = vrot.lane.b32.xlu0 %v1086_v41, %s2005_s23 }
 0x1c6   :  { %1553 = vrot.lane.b32.xlu1 %v1491_v21, %s2008_s25  ;;  %1599 = vrot.lane.b32.xlu0 %v1358_v12, %s2005_s23 }
 0x1ca   :  { %1565 = vrot.lane.b32.xlu1 %v1220_v33, %s2007_s24 }
 0x1ce   :  { %1569 = vrot.lane.b32.xlu1 %v1492_v7, %s2007_s24 }
 0x1d2   :  { %1581 = vrot.lane.b32.xlu1 %v1221_v35, %s2006_s0 }
 0x1d6   :  { %1585 = vrot.lane.b32.xlu1 %v1493_v62, %s2006_s0 }
 0x1da   :  { %1597 = vrot.lane.b32.xlu1 %v1222_v0, %s2005_s23 }
 0x1de   :  { %1601 = vrot.lane.b32.xlu1 %v1494_v37, %s2005_s23 }
 0x1f0   :  { %v1500_v19 = vpop.permute.xlu1 %1499 }
 0x1f1   :  { %v1607_v43 = vsel %vm693_vm0, %v1079_v27, %v1500_v19 }
 0x200   :  { %v1502_v15 = vpop.permute.xlu0 %1501 }
 0x201   :  { %v1608_v49 = vsel %vm693_vm0, %v1215_v5, %v1502_v15 }
 0x205   :  { %v1516_v3 = vpop.permute.xlu0 %1515 }
 0x206   :  { %v1612_v28 = vsel %vm1611_vm7, %v1607_v43, %v1516_v3 }
 0x210   :  { %v1520_v24 = vpop.permute.xlu0 %1519  ;;  %v1504_v9 = vpop.permute.xlu1 %1503 }
 0x211   :  { %v1609_v23 = vsel %vm693_vm0, %v1351_v42, %v1504_v9 }
 0x212   :  { %v1614_v34 = vsel %vm1611_vm7, %v1609_v23, %v1520_v24 }
 0x214   :  { %v1532_v52 = vpop.permute.xlu0 %1531 }
 0x215   :  { %v1617_v54 = vsel %vm1616_vm10, %v1612_v28, %v1532_v52 }
 0x218   :  { %v1536_v61 = vpop.permute.xlu0 %1535 }
 0x219   :  { %v1619_v32 = vsel %vm1616_vm10, %v1614_v34, %v1536_v61 }
 0x21c   :  { %v1548_v59 = vpop.permute.xlu0 %1547 }
 0x21d   :  { %v1622_v29 = vsel %vm1621_vm11, %v1617_v54, %v1548_v59 }
 0x220   :  { %v1506_v18 = vpop.permute.xlu1 %1505  ;;  %v1552_v4 = vpop.permute.xlu0 %1551 }
 0x221   :  { %v1610_v5 = vsel %vm693_vm0, %v1487_v48, %v1506_v18  ;;  %v1624_v48 = vsel %vm1621_vm11, %v1619_v32, %v1552_v4 }
 0x224   :  { %v1518_v45 = vpop.permute.xlu1 %1517  ;;  %v1564_v47 = vpop.permute.xlu0 %1563 }
 0x225   :  { %v1613_v63 = vsel %vm1611_vm7, %v1608_v49, %v1518_v45  ;;  %v1627_v53 = vsel %vm1626_vm14, %v1622_v29, %v1564_v47 }
 0x228   :  { %v1522_v20 = vpop.permute.xlu1 %1521  ;;  %v1568_v55 = vpop.permute.xlu0 %1567 }
 0x229   :  { %v1615_v42 = vsel %vm1611_vm7, %v1610_v5, %v1522_v20  ;;  %v1629_v33 = vsel %vm1626_vm14, %v1624_v48, %v1568_v55 }
 0x22c   :  { %v1534_v25 = vpop.permute.xlu1 %1533  ;;  %v1580_v6 = vpop.permute.xlu0 %1579 }
 0x22d   :  { %v1618_v27 = vsel %vm1616_vm10, %v1613_v63, %v1534_v25  ;;  %v1632_v31 = vsel %vm1631_vm15, %v1627_v53, %v1580_v6 }
 0x230   :  { %v1538_v22 = vpop.permute.xlu1 %1537  ;;  %v1584_v14 = vpop.permute.xlu0 %1583 }
 0x231   :  { %v1620_v41 = vsel %vm1616_vm10, %v1615_v42, %v1538_v22  ;;  %v1634_v40 = vsel %vm1631_vm15, %v1629_v33, %v1584_v14 }
 0x234   :  { %v1550_v1 = vpop.permute.xlu1 %1549  ;;  %v1596_v36 = vpop.permute.xlu0 %1595 }
 0x235   :  { %v1623_v17 = vsel %vm1621_vm11, %v1618_v27, %v1550_v1  ;;  %v1637_v16 = vsel %vm1636_vm1, %v1632_v31, %v1596_v36 }
 0x238   :  { %v1554_v39 = vpop.permute.xlu1 %1553  ;;  %v1600_v21 = vpop.permute.xlu0 %1599 }
 0x239   :  { %v1625_v38 = vsel %vm1621_vm11, %v1620_v41, %v1554_v39  ;;  %v1639_v2 = vsel %vm1636_vm1, %v1634_v40, %v1600_v21 }
 0x23c   :  { %v1566_v51 = vpop.permute.xlu1 %1565 }
 0x23d   :  { %v1628_v44 = vsel %vm1626_vm14, %v1623_v17, %v1566_v51 }
 0x240   :  { %v1570_v8 = vpop.permute.xlu1 %1569 }
 0x241   :  { %v1630_v56 = vsel %vm1626_vm14, %v1625_v38, %v1570_v8 }
 0x244   :  { %v1582_v58 = vpop.permute.xlu1 %1581 }
 0x245   :  { %v1633_v10 = vsel %vm1631_vm15, %v1628_v44, %v1582_v58 }
 0x248   :  { %v1586_v46 = vpop.permute.xlu1 %1585 }
 0x249   :  { %v1635_v7 = vsel %vm1631_vm15, %v1630_v56, %v1586_v46 }
 0x24c   :  { %v1598_v50 = vpop.permute.xlu1 %1597 }
 0x24d   :  { %v1638_v26 = vsel %vm1636_vm1, %v1633_v10, %v1598_v50 }
 0x24e   :  { %v1641_v12 = vpack.c.f32.eXmY %v1637_v16, %v1638_v26, 61788 }
 0x250   :  { %v1602_v13 = vpop.permute.xlu1 %1601 }
 0x251   :  { %v1640_v57 = vsel %vm1636_vm1, %v1635_v7, %v1602_v13 }
 0x252   :  { %v1645_v11 = vpack.c.f32.eXmY %v1639_v2, %v1640_v57, 61788 }
 0x254   :  { %v1649_v35 = vpack.c.b8 %v1645_v11, %v1641_v12 }
 0x256   :  { %1651 = vst [vmem:[#allocation5] sm:$0xff] %v1649_v35 }
 0x257   :  { %1987 = shalt.err (!%p1984_p12)
}
 0x258   :  { %s1988_s13 = scalar_lea.hbm %s2918_s1, 128 }
 0x259   :  { %p1989_p13 = scmp.ne.s32.totalorder %s2918_s1, %s1988_s13  ;;  %p1992_p0 = scmp.lt.u32.totalorder %s1988_s13, %s2918_s1 }
 0x25b   :  { %p1994_p1 = pnand %p1992_p0, %p1989_p13 }
 0x25d   :  { %1997 = shalt.err (!%p1994_p1)
}
 0x25e   :  { %1867 = dma.vmem_to_hbm [thread:$0]  %s1865_s9, 128, %s2918_s1, [#allocation4]  }
 0x25f   :  { %2000 = dma.done.wait [#allocation4], 128  }
 0x260   :  { %2001 = vsyncadd [#allocation4], 4294967168 }
 0x261   :  { %1875 = vsyncpa [#allocation3], 1 }
 0x262   :  { %1876 = vsyncpa [#allocation4], 1 }

</bundles_post_ra>
